<compile_context>
chip_gen: v6e
topology: v6e:2x2x1
jax: 0.10.0
libtpu: 0.0.40
codegen_flags: <defaults>
</compile_context>

<pallas_src>
import functools
import math

import jax
import jax.numpy as jnp
from jax.experimental import pallas as pl
from jax.experimental.pallas import tpu as pltpu

GROUPS = 32
BASE_WIDTH = 4
REDUCTION = 16
OUT_DIMS = (168, 11, 7)
# Static python config (NOT in the traced params pytree -> strides stay static ints).
LAYER_CFG = [  # (planes, num_blocks, stride)
    (64, 3, 1),
    (128, 4, 2),
    (256, 6, 2),
    (512, 3, 2),
]


def _vmem_defaults():
    """Generation-dependent VMEM limit + row-tile cap (conservative fallback)."""
    phys = 64 * 1024 * 1024
    try:
        info = pltpu.get_tpu_info()
        for attr in ("vmem_capacity_bytes", "vmem_bytes", "vmem_size_bytes"):
            if hasattr(info, attr):
                phys = int(getattr(info, attr))
                break
    except Exception:
        pass
    if phys >= 128 * 1024 * 1024:        # v5e / v6e: 128 MiB physical VMEM
        return 100 * 1024 * 1024, 1024
    return 48 * 1024 * 1024, 512         # v7x: 64 MiB physical VMEM


_VMEM_LIMIT, _TM_CAP = _vmem_defaults()
_VMEM_PARAMS = pltpu.CompilerParams(vmem_limit_bytes=_VMEM_LIMIT)


# ----------------------------- Pallas kernels ------------------------------

def _dense_matmul_kernel(a_ref, w_ref, b_ref, o_ref, *, relu):
    # Conv-as-matmul with folded BatchNorm: y = A @ W + bias (+ optional ReLU).
    y = jnp.dot(a_ref[...], w_ref[0], preferred_element_type=jnp.float32)
    y = y + b_ref[...]
    if relu:
        y = jnp.maximum(y, 0.0)
    o_ref[...] = y.astype(o_ref.dtype)


def _grouped_matmul_kernel(a_ref, w_ref, b_ref, o_ref, *, relu, taps):
    # Group-chunked grouped conv: 9 taps x (tm,128)@(128,128) MXU matmuls,
    # f32 accumulation, fused BN bias + optional ReLU, bf16 lane-dense store.
    acc = jnp.dot(a_ref[0], w_ref[0, 0], preferred_element_type=jnp.float32)
    for t in range(1, taps):
        acc = acc + jnp.dot(a_ref[t], w_ref[0, t],
                            preferred_element_type=jnp.float32)
    acc = acc + b_ref[...]
    if relu:
        acc = jnp.maximum(acc, 0.0)
    o_ref[...] = acc.astype(o_ref.dtype)


def _se_residual_kernel(x_ref, r_ref, w1_ref, b1_ref, w2_ref, b2_ref, o_ref):
    # Fused SE (squeeze-excite) + residual add + final ReLU for one image.
    x = x_ref[0]                                            # (HW, C) bf16
    s = jnp.mean(x.astype(jnp.float32), axis=0, keepdims=True)   # squeeze (1,C)
    h = jnp.dot(s.astype(jnp.bfloat16), w1_ref[...],
                preferred_element_type=jnp.float32) + b1_ref[...]
    h = jnp.maximum(h, 0.0)
    z = jnp.dot(h.astype(jnp.bfloat16), w2_ref[...],
                preferred_element_type=jnp.float32) + b2_ref[...]
    g = pl.reciprocal(1.0 + jnp.exp(-z), approx=True)       # sigmoid on EUP
    o_ref[0] = jnp.maximum(x * g + r_ref[0], 0.0).astype(o_ref.dtype)


def _pool_heads_kernel(x_ref, w_ref, b_ref, o_ref):
    # Fused global average pool + concatenated linear heads.
    pooled = jnp.mean(x_ref[...].astype(jnp.float32), axis=1)       # (N, C)
    o_ref[...] = (jnp.dot(pooled.astype(jnp.bfloat16), w_ref[...],
                          preferred_element_type=jnp.float32) + b_ref[...])


# ------------------------------ Kernel wrappers ------------------------------

def _pick_tm(m):
    """Largest row tile <= _TM_CAP that divides m (multiples of 8/16)."""
    for tm in (1024, 512, 256, 128, 64, 32, 16, 8):
        if tm <= _TM_CAP and tm <= m and m % tm == 0:
            return tm
    return m   # m < 8 or not a multiple of 8: single full-height block


def dense_matmul(a, w3, bias, relu):
    """(M,K)@(K,N)+b (+ReLU).  Weight pre-split along N: w3 = (ntn, K, tn).
    Grid = (N tiles, row tiles), both 'parallel'; weight stays resident across
    the inner row axis.  Operands bf16, f32 accumulate, bf16 output."""
    m, k = a.shape
    ntn, _, tn = w3.shape
    tm = _pick_tm(m)
    kern = functools.partial(_dense_matmul_kernel, relu=relu)
    return pl.pallas_call(
        kern,
        out_shape=jax.ShapeDtypeStruct((m, ntn * tn), jnp.bfloat16),
        grid=(ntn, pl.cdiv(m, tm)),
        in_specs=[pl.BlockSpec((tm, k), lambda j, i: (i, 0)),
                  pl.BlockSpec((1, k, tn), lambda j, i: (j, 0, 0)),
                  pl.BlockSpec((1, tn), lambda j, i: (0, j))],
        out_specs=pl.BlockSpec((tm, tn), lambda j, i: (i, j)),
        compiler_params=pltpu.CompilerParams(
            dimension_semantics=("parallel", "parallel"),
            vmem_limit_bytes=_VMEM_LIMIT),
    )(a, w3, bias)


def grouped_matmul(a, w4, bias, relu):
    """Grouped 3x3 conv as chunked matmul.
    a:   (taps, M, C) bf16 im2col patches (natural channel order),
    w4:  (chunks, taps, 128, 128) bf16 (block-diag within each 128-wide chunk),
    out: (M, C) bf16, lane-dense 128-wide stores."""
    taps, m, c = a.shape
    chunks = w4.shape[0]
    tm = _pick_tm(m)
    kern = functools.partial(_grouped_matmul_kernel, relu=relu, taps=taps)
    return pl.pallas_call(
        kern,
        out_shape=jax.ShapeDtypeStruct((m, c), jnp.bfloat16),
        grid=(chunks, pl.cdiv(m, tm)),
        in_specs=[pl.BlockSpec((taps, tm, 128), lambda j, i: (0, i, j)),
                  pl.BlockSpec((1, taps, 128, 128), lambda j, i: (j, 0, 0, 0)),
                  pl.BlockSpec((1, 128), lambda j, i: (0, j))],
        out_specs=pl.BlockSpec((tm, 128), lambda j, i: (i, j)),
        compiler_params=pltpu.CompilerParams(
            dimension_semantics=("parallel", "parallel"),
            vmem_limit_bytes=_VMEM_LIMIT),
    )(a, w4, bias)


def se_residual_relu(x, residual, sep):
    """Fused SE module + residual add + ReLU.  bf16 I/O, f32 math inside."""
    n, h, w, c = x.shape
    hw = h * w
    cr = sep['w1'].shape[1]
    y = pl.pallas_call(
        _se_residual_kernel,
        out_shape=jax.ShapeDtypeStruct((n, hw, c), jnp.bfloat16),
        grid=(n,),
        in_specs=[pl.BlockSpec((1, hw, c), lambda i: (i, 0, 0)),
                  pl.BlockSpec((1, hw, c), lambda i: (i, 0, 0)),
                  pl.BlockSpec((c, cr), lambda i: (0, 0)),
                  pl.BlockSpec((1, cr), lambda i: (0, 0)),
                  pl.BlockSpec((cr, c), lambda i: (0, 0)),
                  pl.BlockSpec((1, c), lambda i: (0, 0))],
        out_specs=pl.BlockSpec((1, hw, c), lambda i: (i, 0, 0)),
        compiler_params=pltpu.CompilerParams(
            dimension_semantics=("parallel",),
            vmem_limit_bytes=_VMEM_LIMIT),
    )(x.reshape(n, hw, c), residual.reshape(n, hw, c),
      sep['w1'], sep['b1'], sep['w2'], sep['b2'])
    return y.reshape(n, h, w, c)


def pool_and_heads(x, w_cat, b_cat):
    """Global average pool + concatenated linear heads in one kernel."""
    n, h, w, c = x.shape
    nout = w_cat.shape[1]
    return pl.pallas_call(
        _pool_heads_kernel,
        out_shape=jax.ShapeDtypeStruct((n, nout), jnp.float32),
        compiler_params=_VMEM_PARAMS,
    )(x.reshape(n, h * w, c), w_cat, b_cat)


# ------------------------------- Glue (plain JAX) ----------------------------

def _extract_patches_dense(x, kh, kw, stride, padding):
    """x: (N,H,W,C) bf16 -> (M, kh*kw*C) tap-major im2col (stem 7x7 only)."""
    n, h, w, c = x.shape
    ho = (h + 2 * padding - kh) // stride + 1
    wo = (w + 2 * padding - kw) // stride + 1
    xp = jnp.pad(x, ((0, 0), (padding, padding), (padding, padding), (0, 0)))
    sl = []
    for i in range(kh):
        for j in range(kw):
            sl.append(xp[:, i:i + (ho - 1) * stride + 1:stride,
                            j:j + (wo - 1) * stride + 1:stride, :])
    p = jnp.stack(sl, axis=3).reshape(n * ho * wo, kh * kw * c)
    return p, ho, wo


def _extract_patches_grouped(x, stride):
    """3x3, pad 1.  Returns (9, M, C) bf16 (tap-leading so the kernel can take
    contiguous (tm,128) slabs per tap).
    TODO(synk): implicit im2col (tap grid axis over the padded input) would
    avoid materializing this 9x patch tensor in HBM."""
    n, h, w, c = x.shape
    kh = kw = 3
    pad = 1
    ho = (h + 2 * pad - kh) // stride + 1
    wo = (w + 2 * pad - kw) // stride + 1
    xp = jnp.pad(x, ((0, 0), (pad, pad), (pad, pad), (0, 0)))
    sl = []
    for i in range(kh):
        for j in range(kw):
            sl.append(xp[:, i:i + (ho - 1) * stride + 1:stride,
                            j:j + (wo - 1) * stride + 1:stride, :])
    p = jnp.stack(sl, axis=0).reshape(kh * kw, n * ho * wo, c)
    return p, ho, wo


def conv_dense(x, cp, *, stride=1, padding=0, kh=1, kw=1, relu=False):
    """Dense (groups=1) conv with folded BN + fused bias/ReLU.  NHWC bf16."""
    n, h, w, c = x.shape
    ntn, _, tn = cp['w'].shape
    cout = ntn * tn
    if kh == 1 and kw == 1:
        xs = x if stride == 1 else x[:, ::stride, ::stride, :]
        ho, wo = xs.shape[1], xs.shape[2]
        a = xs.reshape(n * ho * wo, c)
    else:
        a, ho, wo = _extract_patches_dense(x, kh, kw, stride, padding)
    y = dense_matmul(a, cp['w'], cp['b'], relu)
    return y.reshape(n, ho, wo, cout)


def conv_grouped(x, cp, *, stride=1, relu=True):
    """Grouped 3x3 conv (32 groups) with folded BN + fused bias/ReLU."""
    n, h, w, c = x.shape
    a, ho, wo = _extract_patches_grouped(x, stride)
    y = grouped_matmul(a, cp['w'], cp['b'], relu)
    return y.reshape(n, ho, wo, c)


def max_pool_3x3_s2_ceil(x):
    """MaxPool2d(3, stride=2, ceil_mode=True): running max over 9 taps (bf16)."""
    n, h, w, c = x.shape
    k, s = 3, 2
    ho = -(-(h - k) // s) + 1
    wo = -(-(w - k) // s) + 1
    pad_h = max(0, (ho - 1) * s + k - h)
    pad_w = max(0, (wo - 1) * s + k - w)
    xp = jnp.pad(x, ((0, 0), (0, pad_h), (0, pad_w), (0, 0)),
                 constant_values=-jnp.inf)
    out = None
    for i in range(k):
        for j in range(k):
            sl = xp[:, i:i + (ho - 1) * s + 1:s, j:j + (wo - 1) * s + 1:s, :]
            out = sl if out is None else jnp.maximum(out, sl)
    return out


# ----------------------------- Model forward --------------------------------

def se_resnext50_32x4d_forward(prep, x_nchw):
    x = jnp.transpose(x_nchw, (0, 2, 3, 1)).astype(jnp.bfloat16)   # NCHW->NHWC
    # layer0 (stem): 7x7/2 conv + BN + ReLU, then 3x3/2 ceil maxpool
    x = conv_dense(x, prep['stem'], stride=2, padding=3, kh=7, kw=7, relu=True)
    x = max_pool_3x3_s2_ceil(x)
    # layer1..layer4 (strides come from static LAYER_CFG, not traced params)
    for layer_blocks, (_, _, stride) in zip(prep['layers'], LAYER_CFG):
        for b_i, bp in enumerate(layer_blocks):
            s = stride if b_i == 0 else 1
            out = conv_dense(x, bp['conv1'], relu=True)
            out = conv_grouped(out, bp['conv2'], stride=s, relu=True)
            out = conv_dense(out, bp['conv3'], relu=False)
            if 'down' in bp:
                res = conv_dense(x, bp['down'], stride=s, relu=False)
            else:
                res = x
            x = se_residual_relu(out, res, bp['se'])
    y = pool_and_heads(x, prep['head']['w'], prep['head']['b'])
    n0, n1, _ = OUT_DIMS
    return [y[:, :n0], y[:, n0:n0 + n1], y[:, n0 + n1:]]


# -------------------------- One-time weight prep ------------------------------

def prepare_params(params, eps=1e-5):
    """One-time preprocessing OUTSIDE the jitted forward: BN folding, im2col /
    group-chunked weight layouts, N-tiling, bf16 casts, head concatenation."""

    def fold(bnp):
        scale = bnp['gamma'] / jnp.sqrt(bnp['var'] + eps)
        shift = bnp['beta'] - bnp['mean'] * scale
        return scale, shift

    def dense(w, bnp):
        cout, cin, kh, kw = w.shape
        scale, shift = fold(bnp)
        wm = jnp.transpose(w, (2, 3, 1, 0)).reshape(kh * kw * cin, cout)
        wm = wm * scale[None, :]
        tn = cout if cout < 512 else 256      # N-tiling for wide late-layer convs
        ntn = cout // tn
        w3 = wm.reshape(kh * kw * cin, ntn, tn).transpose(1, 0, 2)
        return {'w': w3.astype(jnp.bfloat16),
                'b': shift.reshape(1, cout).astype(jnp.float32)}

    def grouped(w, bnp):
        # Torch layout (Cout, Cg, 3, 3) -> (chunks, 9, 128, 128): each chunk is
        # 128 output channels (= gchunk groups), block-diagonal within the chunk.
        cout, cg, kh, kw = w.shape
        taps = kh * kw
        ng = cout // GROUPS
        gchunk = 128 // ng
        chunks = cout // 128
        scale, shift = fold(bnp)
        wf = (w * scale[:, None, None, None]).reshape(chunks, gchunk, ng, cg, taps)
        wt = jnp.transpose(wf, (0, 4, 1, 3, 2))            # (chunks, t, gg, cg, ng)
        eye = jnp.eye(gchunk, dtype=wt.dtype)
        wb = wt[:, :, :, :, None, :] * eye[None, None, :, None, :, None]
        w4 = wb.reshape(chunks, taps, gchunk * cg, gchunk * ng)
        return {'w': w4.astype(jnp.bfloat16),
                'b': shift.reshape(1, cout).astype(jnp.float32)}

    def se(sep):
        cr, c = sep['w1'].shape[0], sep['w1'].shape[1]
        return {'w1': sep['w1'].reshape(cr, c).T.astype(jnp.bfloat16),
                'b1': sep['b1'].reshape(1, cr).astype(jnp.float32),
                'w2': sep['w2'].reshape(c, cr).T.astype(jnp.bfloat16),
                'b2': sep['b2'].reshape(1, c).astype(jnp.float32)}

    prep = {'stem': dense(params['stem_w'], params['stem_bn']), 'layers': []}
    for layer_blocks in params['layers']:
        blocks = []
        for p in layer_blocks:
            bp = {'conv1': dense(p['conv1_w'], p['bn1']),
                  'conv2': grouped(p['conv2_w'], p['bn2']),
                  'conv3': dense(p['conv3_w'], p['bn3']),
                  'se': se(p['se'])}
            if 'down_w' in p:
                bp['down'] = dense(p['down_w'], p['down_bn'])
            blocks.append(bp)
        prep['layers'].append(blocks)
    w0, b0 = params['l0']
    w1, b1 = params['l1']
    w2, b2 = params['l2']
    w_cat = jnp.concatenate([w0, w1, w2], axis=0).T.astype(jnp.bfloat16)  # (2048,186)
    b_cat = jnp.concatenate([b0, b1, b2], axis=0).reshape(1, -1).astype(jnp.float32)
    prep['head'] = {'w': w_cat, 'b': b_cat}
    return prep


# --------------------------- Parameter creation ------------------------------

def build_params(key):
    counter = [0]

    def nk():
        counter[0] += 1
        return jax.random.fold_in(key, counter[0])

    def conv_w(cout, cin, kh, kw):
        std = math.sqrt(2.0 / (cin * kh * kw))
        return std * jax.random.normal(nk(), (cout, cin, kh, kw), jnp.float32)

    def bn(c):
        return {'gamma': jnp.ones((c,), jnp.float32),
                'beta': jnp.zeros((c,), jnp.float32),
                'mean': jnp.zeros((c,), jnp.float32),
                'var': jnp.ones((c,), jnp.float32)}

    def lin(cout, cin):
        bound = 1.0 / math.sqrt(cin)
        w = bound * jax.random.normal(nk(), (cout, cin), jnp.float32)
        b = bound * jax.random.normal(nk(), (cout,), jnp.float32)
        return (w, b)

    params = {'stem_w': conv_w(64, 3, 7, 7), 'stem_bn': bn(64), 'layers': []}
    inplanes = 64
    for planes, num_blocks, _ in LAYER_CFG:
        width = (planes * BASE_WIDTH // 64) * GROUPS
        out_c = planes * 4
        blocks = []
        for b_i in range(num_blocks):
            p = {
                'conv1_w': conv_w(width, inplanes, 1, 1),
                'bn1': bn(width),
                'conv2_w': conv_w(width, width // GROUPS, 3, 3),
                'bn2': bn(width),
                'conv3_w': conv_w(out_c, width, 1, 1),
                'bn3': bn(out_c),
                'se': {
                    'w1': conv_w(out_c // REDUCTION, out_c, 1, 1),
                    'b1': jnp.zeros((out_c // REDUCTION,), jnp.float32),
                    'w2': conv_w(out_c, out_c // REDUCTION, 1, 1),
                    'b2': jnp.zeros((out_c,), jnp.float32),
                },
            }
            if b_i == 0:
                p['down_w'] = conv_w(out_c, inplanes, 1, 1)
                p['down_bn'] = bn(out_c)
            blocks.append(p)
            inplanes = out_c
        params['layers'].append(blocks)
    params['l0'] = lin(168, 2048)
    params['l1'] = lin(11, 2048)
    params['l2'] = lin(7, 2048)
    return params


# --------------------------------- Main --------------------------------------

if __name__ == "__main__":
    root = jax.random.PRNGKey(0)
    params = build_params(jax.random.fold_in(root, 1))
    # One-time weight preprocessing (outside jit).
    prep = jax.block_until_ready(prepare_params(params))

    # Quick numerical self-check of the group-chunked grouped-conv lowering
    # against lax.conv_general_dilated (BN here is identity, so folded == raw).
    xt = jax.random.normal(jax.random.fold_in(root, 3), (1, 8, 8, 512), jnp.float32)
    got = conv_grouped(xt.astype(jnp.bfloat16),
                       prep['layers'][2][0]['conv2'], stride=1, relu=False)
    ref = jax.lax.conv_general_dilated(
        xt, params['layers'][2][0]['conv2_w'], (1, 1), ((1, 1), (1, 1)),
        dimension_numbers=('NHWC', 'OIHW', 'NHWC'), feature_group_count=GROUPS)
    rel = jnp.linalg.norm(got.astype(jnp.float32) - ref) / jnp.linalg.norm(ref)
    assert float(rel) < 0.03, f"grouped conv lowering mismatch: rel={float(rel)}"

    # Smallest input that survives the /32 downsampling with a non-trivial
    # final feature map (2x2): (batch=2, 3, 64, 64), PyTorch NCHW convention.
    x = jax.random.normal(jax.random.fold_in(root, 2), (2, 3, 64, 64), jnp.float32)

    fwd = jax.jit(se_resnext50_32x4d_forward)
    l0, l1, l2 = fwd(prep, x)
    jax.block_until_ready((l0, l1, l2))
    assert l0.shape == (2, 168) and l1.shape == (2, 11) and l2.shape == (2, 7)
    assert jnp.all(jnp.isfinite(l0)) and jnp.all(jnp.isfinite(l1)) and jnp.all(jnp.isfinite(l2))
    print("KERNEL_OK")
</pallas_src>

<mosaic_0001>
module attributes {stable_mosaic.version = 11 : i64} {
  func.func @_grouped_matmul_kernel(%arg0: i32, %arg1: i32, %arg2: memref<9x64x128xbf16, #tpu.memory_space<vmem>>, %arg3: memref<1x9x128x128xbf16, #tpu.memory_space<vmem>>, %arg4: memref<1x128xf32, #tpu.memory_space<vmem>>, %arg5: memref<64x128xbf16, #tpu.memory_space<vmem>>) attributes {dimension_semantics = [#tpu.dimension_semantics<parallel>, #tpu.dimension_semantics<parallel>], iteration_bounds = array<i64: 4, 1>, scalar_prefetch = 0 : i64, scratch_operands = 0 : i64, tpu.core_type = #tpu.core_type<tc>, window_params = [{transform_indices = @transform_0, window_bounds = array<i64: 9, 64, 128>}, {transform_indices = @transform_1, window_bounds = array<i64: 1, 9, 128, 128>}, {transform_indices = @transform_2, window_bounds = array<i64: 1, 128>}, {transform_indices = @transform_3, window_bounds = array<i64: 64, 128>}]} {
    %c0 = arith.constant 0 : index
    %c0_0 = arith.constant 0 : index
    %c0_1 = arith.constant 0 : index
    %0 = vector.load %arg2[%c0, %c0_0, %c0_1] : memref<9x64x128xbf16, #tpu.memory_space<vmem>>, vector<1x64x128xbf16>
    %1 = vector.shape_cast %0 : vector<1x64x128xbf16> to vector<64x128xbf16>
    %c0_2 = arith.constant 0 : index
    %c0_3 = arith.constant 0 : index
    %c0_4 = arith.constant 0 : index
    %c0_5 = arith.constant 0 : index
    %2 = vector.load %arg3[%c0_2, %c0_3, %c0_4, %c0_5] : memref<1x9x128x128xbf16, #tpu.memory_space<vmem>>, vector<1x1x128x128xbf16>
    %3 = vector.shape_cast %2 : vector<1x1x128x128xbf16> to vector<128x128xbf16>
    %cst = arith.constant dense<0.000000e+00> : vector<64x128xf32>
    %4 = tpu.matmul %1, %3, %cst {dimension_numbers = #tpu.dot_dimension_numbers<[1], [0], [0], [1], [0, 0, 1, 1], [], []>} : vector<64x128xbf16>, vector<128x128xbf16>, vector<64x128xf32> -> vector<64x128xf32>
    %c1 = arith.constant 1 : index
    %c0_6 = arith.constant 0 : index
    %c0_7 = arith.constant 0 : index
    %5 = vector.load %arg2[%c1, %c0_6, %c0_7] : memref<9x64x128xbf16, #tpu.memory_space<vmem>>, vector<1x64x128xbf16>
    %6 = vector.shape_cast %5 : vector<1x64x128xbf16> to vector<64x128xbf16>
    %c0_8 = arith.constant 0 : index
    %c1_9 = arith.constant 1 : index
    %c0_10 = arith.constant 0 : index
    %c0_11 = arith.constant 0 : index
    %7 = vector.load %arg3[%c0_8, %c1_9, %c0_10, %c0_11] : memref<1x9x128x128xbf16, #tpu.memory_space<vmem>>, vector<1x1x128x128xbf16>
    %8 = vector.shape_cast %7 : vector<1x1x128x128xbf16> to vector<128x128xbf16>
    %cst_12 = arith.constant dense<0.000000e+00> : vector<64x128xf32>
    %9 = tpu.matmul %6, %8, %cst_12 {dimension_numbers = #tpu.dot_dimension_numbers<[1], [0], [0], [1], [0, 0, 1, 1], [], []>} : vector<64x128xbf16>, vector<128x128xbf16>, vector<64x128xf32> -> vector<64x128xf32>
    %10 = arith.addf %4, %9 : vector<64x128xf32>
    %c2 = arith.constant 2 : index
    %c0_13 = arith.constant 0 : index
    %c0_14 = arith.constant 0 : index
    %11 = vector.load %arg2[%c2, %c0_13, %c0_14] : memref<9x64x128xbf16, #tpu.memory_space<vmem>>, vector<1x64x128xbf16>
    %12 = vector.shape_cast %11 : vector<1x64x128xbf16> to vector<64x128xbf16>
    %c0_15 = arith.constant 0 : index
    %c2_16 = arith.constant 2 : index
    %c0_17 = arith.constant 0 : index
    %c0_18 = arith.constant 0 : index
    %13 = vector.load %arg3[%c0_15, %c2_16, %c0_17, %c0_18] : memref<1x9x128x128xbf16, #tpu.memory_space<vmem>>, vector<1x1x128x128xbf16>
    %14 = vector.shape_cast %13 : vector<1x1x128x128xbf16> to vector<128x128xbf16>
    %cst_19 = arith.constant dense<0.000000e+00> : vector<64x128xf32>
    %15 = tpu.matmul %12, %14, %cst_19 {dimension_numbers = #tpu.dot_dimension_numbers<[1], [0], [0], [1], [0, 0, 1, 1], [], []>} : vector<64x128xbf16>, vector<128x128xbf16>, vector<64x128xf32> -> vector<64x128xf32>
    %16 = arith.addf %10, %15 : vector<64x128xf32>
    %c3 = arith.constant 3 : index
    %c0_20 = arith.constant 0 : index
    %c0_21 = arith.constant 0 : index
    %17 = vector.load %arg2[%c3, %c0_20, %c0_21] : memref<9x64x128xbf16, #tpu.memory_space<vmem>>, vector<1x64x128xbf16>
    %18 = vector.shape_cast %17 : vector<1x64x128xbf16> to vector<64x128xbf16>
    %c0_22 = arith.constant 0 : index
    %c3_23 = arith.constant 3 : index
    %c0_24 = arith.constant 0 : index
    %c0_25 = arith.constant 0 : index
    %19 = vector.load %arg3[%c0_22, %c3_23, %c0_24, %c0_25] : memref<1x9x128x128xbf16, #tpu.memory_space<vmem>>, vector<1x1x128x128xbf16>
    %20 = vector.shape_cast %19 : vector<1x1x128x128xbf16> to vector<128x128xbf16>
    %cst_26 = arith.constant dense<0.000000e+00> : vector<64x128xf32>
    %21 = tpu.matmul %18, %20, %cst_26 {dimension_numbers = #tpu.dot_dimension_numbers<[1], [0], [0], [1], [0, 0, 1, 1], [], []>} : vector<64x128xbf16>, vector<128x128xbf16>, vector<64x128xf32> -> vector<64x128xf32>
    %22 = arith.addf %16, %21 : vector<64x128xf32>
    %c4 = arith.constant 4 : index
    %c0_27 = arith.constant 0 : index
    %c0_28 = arith.constant 0 : index
    %23 = vector.load %arg2[%c4, %c0_27, %c0_28] : memref<9x64x128xbf16, #tpu.memory_space<vmem>>, vector<1x64x128xbf16>
    %24 = vector.shape_cast %23 : vector<1x64x128xbf16> to vector<64x128xbf16>
    %c0_29 = arith.constant 0 : index
    %c4_30 = arith.constant 4 : index
    %c0_31 = arith.constant 0 : index
    %c0_32 = arith.constant 0 : index
    %25 = vector.load %arg3[%c0_29, %c4_30, %c0_31, %c0_32] : memref<1x9x128x128xbf16, #tpu.memory_space<vmem>>, vector<1x1x128x128xbf16>
    %26 = vector.shape_cast %25 : vector<1x1x128x128xbf16> to vector<128x128xbf16>
    %cst_33 = arith.constant dense<0.000000e+00> : vector<64x128xf32>
    %27 = tpu.matmul %24, %26, %cst_33 {dimension_numbers = #tpu.dot_dimension_numbers<[1], [0], [0], [1], [0, 0, 1, 1], [], []>} : vector<64x128xbf16>, vector<128x128xbf16>, vector<64x128xf32> -> vector<64x128xf32>
    %28 = arith.addf %22, %27 : vector<64x128xf32>
    %c5 = arith.constant 5 : index
    %c0_34 = arith.constant 0 : index
    %c0_35 = arith.constant 0 : index
    %29 = vector.load %arg2[%c5, %c0_34, %c0_35] : memref<9x64x128xbf16, #tpu.memory_space<vmem>>, vector<1x64x128xbf16>
    %30 = vector.shape_cast %29 : vector<1x64x128xbf16> to vector<64x128xbf16>
    %c0_36 = arith.constant 0 : index
    %c5_37 = arith.constant 5 : index
    %c0_38 = arith.constant 0 : index
    %c0_39 = arith.constant 0 : index
    %31 = vector.load %arg3[%c0_36, %c5_37, %c0_38, %c0_39] : memref<1x9x128x128xbf16, #tpu.memory_space<vmem>>, vector<1x1x128x128xbf16>
    %32 = vector.shape_cast %31 : vector<1x1x128x128xbf16> to vector<128x128xbf16>
    %cst_40 = arith.constant dense<0.000000e+00> : vector<64x128xf32>
    %33 = tpu.matmul %30, %32, %cst_40 {dimension_numbers = #tpu.dot_dimension_numbers<[1], [0], [0], [1], [0, 0, 1, 1], [], []>} : vector<64x128xbf16>, vector<128x128xbf16>, vector<64x128xf32> -> vector<64x128xf32>
    %34 = arith.addf %28, %33 : vector<64x128xf32>
    %c6 = arith.constant 6 : index
    %c0_41 = arith.constant 0 : index
    %c0_42 = arith.constant 0 : index
    %35 = vector.load %arg2[%c6, %c0_41, %c0_42] : memref<9x64x128xbf16, #tpu.memory_space<vmem>>, vector<1x64x128xbf16>
    %36 = vector.shape_cast %35 : vector<1x64x128xbf16> to vector<64x128xbf16>
    %c0_43 = arith.constant 0 : index
    %c6_44 = arith.constant 6 : index
    %c0_45 = arith.constant 0 : index
    %c0_46 = arith.constant 0 : index
    %37 = vector.load %arg3[%c0_43, %c6_44, %c0_45, %c0_46] : memref<1x9x128x128xbf16, #tpu.memory_space<vmem>>, vector<1x1x128x128xbf16>
    %38 = vector.shape_cast %37 : vector<1x1x128x128xbf16> to vector<128x128xbf16>
    %cst_47 = arith.constant dense<0.000000e+00> : vector<64x128xf32>
    %39 = tpu.matmul %36, %38, %cst_47 {dimension_numbers = #tpu.dot_dimension_numbers<[1], [0], [0], [1], [0, 0, 1, 1], [], []>} : vector<64x128xbf16>, vector<128x128xbf16>, vector<64x128xf32> -> vector<64x128xf32>
    %40 = arith.addf %34, %39 : vector<64x128xf32>
    %c7 = arith.constant 7 : index
    %c0_48 = arith.constant 0 : index
    %c0_49 = arith.constant 0 : index
    %41 = vector.load %arg2[%c7, %c0_48, %c0_49] : memref<9x64x128xbf16, #tpu.memory_space<vmem>>, vector<1x64x128xbf16>
    %42 = vector.shape_cast %41 : vector<1x64x128xbf16> to vector<64x128xbf16>
    %c0_50 = arith.constant 0 : index
    %c7_51 = arith.constant 7 : index
    %c0_52 = arith.constant 0 : index
    %c0_53 = arith.constant 0 : index
    %43 = vector.load %arg3[%c0_50, %c7_51, %c0_52, %c0_53] : memref<1x9x128x128xbf16, #tpu.memory_space<vmem>>, vector<1x1x128x128xbf16>
    %44 = vector.shape_cast %43 : vector<1x1x128x128xbf16> to vector<128x128xbf16>
    %cst_54 = arith.constant dense<0.000000e+00> : vector<64x128xf32>
    %45 = tpu.matmul %42, %44, %cst_54 {dimension_numbers = #tpu.dot_dimension_numbers<[1], [0], [0], [1], [0, 0, 1, 1], [], []>} : vector<64x128xbf16>, vector<128x128xbf16>, vector<64x128xf32> -> vector<64x128xf32>
    %46 = arith.addf %40, %45 : vector<64x128xf32>
    %c8 = arith.constant 8 : index
    %c0_55 = arith.constant 0 : index
    %c0_56 = arith.constant 0 : index
    %47 = vector.load %arg2[%c8, %c0_55, %c0_56] : memref<9x64x128xbf16, #tpu.memory_space<vmem>>, vector<1x64x128xbf16>
    %48 = vector.shape_cast %47 : vector<1x64x128xbf16> to vector<64x128xbf16>
    %c0_57 = arith.constant 0 : index
    %c8_58 = arith.constant 8 : index
    %c0_59 = arith.constant 0 : index
    %c0_60 = arith.constant 0 : index
    %49 = vector.load %arg3[%c0_57, %c8_58, %c0_59, %c0_60] : memref<1x9x128x128xbf16, #tpu.memory_space<vmem>>, vector<1x1x128x128xbf16>
    %50 = vector.shape_cast %49 : vector<1x1x128x128xbf16> to vector<128x128xbf16>
    %cst_61 = arith.constant dense<0.000000e+00> : vector<64x128xf32>
    %51 = tpu.matmul %48, %50, %cst_61 {dimension_numbers = #tpu.dot_dimension_numbers<[1], [0], [0], [1], [0, 0, 1, 1], [], []>} : vector<64x128xbf16>, vector<128x128xbf16>, vector<64x128xf32> -> vector<64x128xf32>
    %52 = arith.addf %46, %51 : vector<64x128xf32>
    %c0_62 = arith.constant 0 : index
    %c0_63 = arith.constant 0 : index
    %53 = vector.load %arg4[%c0_62, %c0_63] : memref<1x128xf32, #tpu.memory_space<vmem>>, vector<1x128xf32>
    %54 = vector.broadcast %53 : vector<1x128xf32> to vector<64x128xf32>
    %55 = arith.addf %52, %54 : vector<64x128xf32>
    %56 = arith.truncf %55 : vector<64x128xf32> to vector<64x128xbf16>
    %c0_64 = arith.constant 0 : index
    %c0_65 = arith.constant 0 : index
    %57 = vector.load %arg5[%c0_64, %c0_65] : memref<64x128xbf16, #tpu.memory_space<vmem>>, vector<64x128xbf16>
    tpu.vector_store %arg5[%c0_64, %c0_65], %56 {strides = array<i32>} : memref<64x128xbf16, #tpu.memory_space<vmem>>, vector<64x128xbf16>,
    return
  }
  func.func @transform_0(%arg0: i32, %arg1: i32) -> (i32, i32, i32) {
    %c0_i32 = arith.constant 0 : i32
    %c0_i32_0 = arith.constant 0 : i32
    return %c0_i32, %arg1, %arg0 : i32, i32, i32
  }
  func.func @transform_1(%arg0: i32, %arg1: i32) -> (i32, i32, i32, i32) {
    %c0_i32 = arith.constant 0 : i32
    %c0_i32_0 = arith.constant 0 : i32
    %c0_i32_1 = arith.constant 0 : i32
    %c0_i32_2 = arith.constant 0 : i32
    return %arg0, %c0_i32, %c0_i32_0, %c0_i32_1 : i32, i32, i32, i32
  }
  func.func @transform_2(%arg0: i32, %arg1: i32) -> (i32, i32) {
    %c0_i32 = arith.constant 0 : i32
    %c0_i32_0 = arith.constant 0 : i32
    return %c0_i32, %arg0 : i32, i32
  }
  func.func @transform_3(%arg0: i32, %arg1: i32) -> (i32, i32) {
    %c0_i32 = arith.constant 0 : i32
    return %arg1, %arg0 : i32, i32
  }
}

</mosaic_0001>

<bundles_post_ra>
// kernel: tpu_custom_call.1
= control target key start
LH: loop header
LB: loop body
LE: loop exit
PB: predicated region body
PF: predicated region fallthrough
CT: control target
= control target key end

     0   :  { %s3404_s0 = inlined_call_operand.hbm [shape: bf16[9,64,512], index: 0, kind: input, shape index: {}]   ;;  %s3405_s1 = inlined_call_operand.hbm [shape: bf16[4,9,128,128], index: 1, kind: input, shape index: {}]   ;;  %s3406_s2 = inlined_call_operand.hbm [shape: f32[1,512], index: 2, kind: input, shape index: {}]   ;;  %s3407_s3 = inlined_call_operand.hbm [shape: bf16[64,512], index: 3, kind: output, shape index: {}]  }
   0x1   :  { %3412 = sst [smem:[#allocation19_spill]] %s3405_s1 }
   0x2   :  { %8 = vsyncpa [#allocation3], 0 }
   0x3   :  { %10 = vsyncpa [#allocation3 + $0x1], 0 }
   0x4   :  { %11 = vsyncpa [#allocation6], 0 }
   0x5   :  { %13 = vsyncpa [#allocation6 + $0x1], 0 }
   0x6   :  { %14 = vsyncpa [#allocation4], 0 }
   0x7   :  { %16 = vsyncpa [#allocation4 + $0x1], 0  ;;  %s3082_s12 = smov 0   ;;  %s3084_s13 = smov 0  }
   0x8   :  { %s3086_s14 = smov 0   ;;  %s3088_s15 = smov 0  }
   0x9   :  { %s3090_s16 = smov 0   ;;  %s3092_s17 = smov 0  }
   0xa LB: > { %3413 = sst [smem:[#allocation12_spill]] %s3038_s14  ;;  %s3113_s18 = sadd.s32 4294967295, %s3050_s17   ;;  %s3050_s17 = sphi %s3092_s17, %s22_s17   ;;  %s3046_s16 = sphi %s3090_s16, %s3438_s16   ;;  %s3042_s15 = sphi %s3088_s15, %s3437_s15   ;;  %s3038_s14 = sphi %s3086_s14, %s3433_s14   ;;  %s3034_s13 = sphi %s3084_s13, %s3436_s13   ;;  %s3030_s12 = sphi %s3082_s12, %s3435_s12  }
   0xb   : > { %s1999_s19 = sadd.s32 4294967294, %s3050_s17   ;;  %s34_s20 = sadd.s32 1, %s3046_s16 }
   0xc   : > { %s43_s21 = sadd.s32 1, %s3038_s14  ;;  %p36_p0 = scmp.ge.s32.totalorder %s34_s20, 4 }
   0xd   : > { %p50_p1 = scmp.ne.s32.totalorder %s3038_s14, %s3034_s13  ;;  %p51_p2 = scmp.eq.s32.totalorder %s3050_s17, 0 }
   0xe   : > { %p56_p3 = scmp.ne.s32.totalorder %s3034_s13, %s3030_s12  ;;  %s3440_s20 = smov (%p36_p0, %s34_s20), 0 }
   0xf   : > { %3414 = sst [smem:[#allocation13_spill]] %s3440_s20  ;;  %p52_p4 = por %p51_p2, %p50_p1 }
  0x10   : > { %p57_p5 = scmp.eq.s32.totalorder %s3113_s18, 0  ;;  %s39_s22 = ssub.s32 %s3046_s16, %s3440_s20 }
  0x11   : > { %p134_p6 = scmp.eq.s32.totalorder %s3113_s18, 3  ;;  %p41_p7 = scmp.eq.s32.totalorder %s39_s22, 0 }
  0x12   : > { %p3129_p8 = por %p57_p5, %p56_p3  ;;  %p140_p10 = scmp.eq.s32.totalorder %s1999_s19, 3 }
  0x13   : > { %p3133_p9 = por %p134_p6, %p50_p1  ;;  %p2718_p12 = scmp.lt.s32.totalorder %s3050_s17, 4 }
  0x14   : > { %s3138_s25 = scalar_select %p41_p7, %s3038_s14, %s43_s21  }
  0x15   : > { %p3140_p11 = por %p140_p10, %p56_p3  ;;  %s3146_s27 = sand.u32 1, %s3038_s14  }
  0x16   : > { %3417 = sst [smem:[#allocation14_spill]] %s3138_s25  ;;  %p3148_p13 = pnand %p2718_p12, %p52_p4 }
  0x17   : > { %s183_s29 = sand.u32 1, %s3050_s17   ;;  %s2692_s30 = smul.u32 576, %s3146_s27 }
  0x18   : > { %s2693_s4 = smul.u32 9216, %s3046_s16  ;;  %p2005_p0 = scmp.ge.s32.totalorder %s3050_s17, 1 }
  0x19   : > { %s3420_s1 = sld [smem:[#allocation19_spill]]  ;;  %s187_s8 = scalar_lea.vmem [#allocation5], %s2692_s30 }
  0x1a   : > { %s194_s9 = sshll.u32 %s187_s8, 4  ;;  %p219_p1 = scmp.lt.s32.totalorder %s3050_s17, 5  ;;  %s195_s9 = int_to_ptr.vmem [resolvable:$true] %s194_s9 }
  0x1b   : > { %s3160_s10 = scalar_lea.sflag [#allocation6], %s183_s29  ;;  %p2884_p2 = pneg %p3148_p13 }
  0x1c   : > { %s2895_s11 = scalar_lea.vmem %s195_s9, 9216  ;;  %s3052_s19 = smov [#allocation5]  }
  0x1d   : > { %p2896_p3 = scmp.ne.s32.totalorder %s195_s9, %s2895_s11  ;;  %s2900_s21 = sshll.u32 %s3052_s19, 4  ;;  %s2901_s21 = int_to_ptr.vmem [resolvable:$false] %s2900_s21 }
  0x1e   : > { %s2902_s22 = scalar_lea.vmem %s2901_s21, 18432  ;;  %p2903_p6 = scmp.lt.s32.totalorder %s195_s9, %s2901_s21 }
  0x1f   : > { %s193_s7 = scalar_lea.hbm %s3420_s1, %s2693_s4  ;;  %p2898_p4 = pnand %p2896_p3, %p2884_p2 }
  0x20   : > { %p2904_p7 = scmp.lt.s32.totalorder %s2902_s22, %s2895_s11 }
  0x21   : > { %p2899_p5 = pneg %p2898_p4 }
  0x22   : > { %p2905_p10 = por %p2904_p7, %p2903_p6 }
  0x24   : > { %p2906_p12 = pnand %p2905_p10, %p2899_p5 }
  0x26   : > { %2909 = shalt.err (!%p2906_p12)
}
  0x27   : > { %s3409_s30 = smov 64   ;;  %s3410_s29 = smov 4  }
  0x28   : > { %2710 = dma.hbm_to_vmem [thread:$0]  (!%p3148_p13), %s193_s7, 9216, %s195_s9, %s3160_s10, %s3409_s30, %s3409_s30, %s3410_s29  }
  0x29   : > { %p3177_p3 = pnand %p2005_p0, %p219_p1  ;;  %s2691_s5 = smul.u32 288, %s3146_s27 }
  0x2a   : > { %s2002_s6 = sshll.u32 %s3046_s16, 6  ;;  %s2004_s1 = sshll.u32 %s3046_s16, 4 }
  0x2b   : > { %s172_s19 = scalar_lea.hbm %s3404_s0, %s2002_s6  ;;  %s164_s21 = scalar_lea.vmem [#allocation2], %s2691_s5 }
  0x2c   : > { %s173_s22 = sshll.u32 %s164_s21, 4  ;;  %s3190_s7 = scalar_lea.hbm %s3406_s2, %s2004_s1  ;;  %s174_s22 = int_to_ptr.vmem [resolvable:$true] %s173_s22 }
  0x2d   : > { %s161_s9 = scalar_lea.sflag [#allocation3], %s3146_s27  ;;  %s2923_s30 = scalar_lea.vmem %s174_s22, 4608 }
  0x2e   : > { %p2924_p0 = scmp.ne.s32.totalorder %s174_s22, %s2923_s30  ;;  %s3055_s29 = smov [#allocation2]  }
  0x2f   : > { %s2928_s14 = sshll.u32 %s3055_s29, 4  ;;  %s2929_s14 = int_to_ptr.vmem [resolvable:$false] %s2928_s14 }
  0x30   : > { %p2926_p1 = pnand %p2924_p0, %p2884_p2  ;;  %s2930_s6 = scalar_lea.vmem %s2929_s14, 9216 }
  0x31   : > { %p2931_p5 = scmp.lt.s32.totalorder %s174_s22, %s2929_s14  ;;  %p2932_p6 = scmp.lt.s32.totalorder %s2930_s6, %s2923_s30 }
  0x32   : > { %p2927_p4 = pneg %p2926_p1 }
  0x33   : > { %p2933_p7 = por %p2932_p6, %p2931_p5 }
  0x35   : > { %p2934_p10 = pnand %p2933_p7, %p2927_p4 }
  0x37   : > { %2937 = shalt.err (!%p2934_p10)
}
  0x38   : > { %s3056_s5 = smov 256   ;;  %s3422_s1 = smov 4  }
  0x39   : > { %s3423_s20 = smov 64   ;;  %s207_s25 = scalar_lea.vmem [#allocation7], %s3146_s27 }
  0x3a   : > { %2707 = dma.hbm_to_vmem [thread:$0]  (!%p3148_p13), %s172_s19, 4608, %s174_s22, %s161_s9, %s3056_s5, %s3423_s20, %s3422_s1  }
  0x3b   : > { %s214_s8 = sshll.u32 %s207_s25, 4  ;;  %s3057_s14 = smov [#allocation7]   ;;  %s215_s8 = int_to_ptr.vmem [resolvable:$true] %s214_s8 }
  0x3c   : > { %s2951_s11 = scalar_lea.vmem %s215_s8, 16  ;;  %s2956_s30 = sshll.u32 %s3057_s14, 4  ;;  %s2957_s30 = int_to_ptr.vmem [resolvable:$false] %s2956_s30 }
  0x3d   : > { %p2952_p12 = scmp.ne.s32.totalorder %s215_s8, %s2951_s11  ;;  %s2958_s29 = scalar_lea.vmem %s2957_s30, 32 }
  0x3e   : > { %p2959_p4 = scmp.lt.s32.totalorder %s215_s8, %s2957_s30  ;;  %p2960_p5 = scmp.lt.s32.totalorder %s2958_s29, %s2951_s11 }
  0x3f   : > { %p2954_p0 = pnand %p2952_p12, %p2884_p2 }
  0x40   : > { %p2961_p6 = por %p2960_p5, %p2959_p4 }
  0x41   : > { %p2955_p1 = pneg %p2954_p0 }
  0x43   : > { %p2962_p7 = pnand %p2961_p6, %p2955_p1 }
  0x45   : > { %2965 = shalt.err (!%p2962_p7)
}
  0x46   : > { %2713 = dma.hbm_to_vmem [thread:$0]  (!%p3148_p13), %s3190_s7, 16, %s215_s8, %s3160_s10  }
  0x47   : > { %223 = sbr.rel (%p3177_p3) target bundleno = 467 (0x1d3), region = 32 }
  0x4c   : > { %s3211_s27 = sand.u32 1, %s3034_s13  }
  0x4d   : > { %s2694_s19 = smul.u32 288, %s3211_s27  ;;  %s226_s21 = scalar_lea.sflag [#allocation3], %s3211_s27 }
  0x4f   : > { %s3215_s22 = scalar_lea.vmem [#allocation2], %s2694_s19 }
  0x50   : > { %3017 = dma.done.wait (%p3129_p8), %s226_s21, 4608  }
  0x51   : > { %3019 = vsyncadd (%p3129_p8), %s226_s21, 4294962688  ;;  %s234_s28 = sand.u32 1, %s3113_s18   ;;  %s2695_s10 = smul.u32 576, %s3211_s27 }
  0x52   : > { %s235_s4 = scalar_lea.sflag [#allocation6], %s234_s28 }
  0x53   : > { %s3223_s7 = scalar_lea.vmem [#allocation5], %s2695_s10 }
  0x54   : > { %3021 = dma.done.wait (%p3129_p8), %s235_s4, 9232  }
  0x55   : > { %3023 = vsyncadd (%p3129_p8), %s235_s4, 4294958064  ;;  %v2774_v0 = vld [vmem:[%s3223_s7 + $0x78] sm:$0xff]   ;;  %v2776_v2 = vld [vmem:[%s3223_s7 + $0x70] sm:$0xff]   ;;  %s2006_s18 = sshll.u32 %s3211_s27, 5  ;;  %s246_s23 = scalar_lea.vmem [#allocation7], %s3211_s27 }
  0x56   : > { %v2775_v1 = vld [vmem:[%s3223_s7 + $0x38] sm:$0xff]   ;;  %2459 = vmatprep.subr.bf16.mxu0 %v2774_v0  ;;  %v2777_v3 = vld [vmem:[%s3223_s7 + $0x30] sm:$0xff]   ;;  %v2778_v4 = vld [vmem:[%s3223_s7 + $0x68] sm:$0xff]   ;;  %s277_s9 = scalar_lea.vmem [#allocation8], %s2006_s18  ;;  %s2317_s5 = sshll.u32 %s3042_s15, 6 }
  0x57   : > { %2483 = vmatprep.subr.bf16.mxu1 %v2775_v1  ;;  %2460 = vmatpush3.bf16.msra.mxu0 %v2774_v0  ;;  %v2779_v5 = vld [vmem:[%s3223_s7 + $0x28] sm:$0xff]   ;;  %v2780_v6 = vld [vmem:[%s3223_s7 + $0x60] sm:$0xff]   ;;  %v2782_v8 = vld [vmem:[%s3223_s7 + $0x58] sm:$0xff]   ;;  %s1873_s6 = sshll.u32 %s277_s9, 4  ;;  %s3357_s25 = scalar_lea.hbm %s3407_s3, %s2317_s5  ;;  %s3352_s6 = int_to_ptr.vmem [resolvable:$true] %s1873_s6 }
  0x58   : > { %2484 = vmatpush3.bf16.msra.mxu1 %v2775_v1  ;;  %2461 = vmatprep.subr.bf16.mxu0 %v2776_v2  ;;  %v2781_v7 = vld [vmem:[%s3223_s7 + $0x20] sm:$0xff]   ;;  %v2783_v9 = vld [vmem:[%s3223_s7 + $0x18] sm:$0xff]   ;;  %v2784_v10 = vld [vmem:[%s3223_s7 + $0x50] sm:$0xff]   ;;  %s1858_s15 = scalar_lea.sflag [#allocation4], %s3211_s27  ;;  %s2966_s8 = scalar_lea.vmem %s3352_s6, 512 }
  0x59   : > { %2485 = vmatprep.subr.bf16.mxu1 %v2777_v3  ;;  %v2785_v11 = vld [vmem:[%s3223_s7 + $0x10] sm:$0xff]   ;;  %v2790_v12 = vld [vmem:[%s3215_s22 + $0x20] sm:$0xff]   ;;  %v2786_v14 = vld [vmem:[%s3223_s7 + $0x48] sm:$0xff]   ;;  %p2967_p8 = scmp.ne.s32.totalorder %s3352_s6, %s2966_s8  ;;  %s3058_s11 = smov [#allocation8]  }
  0x5a   : > { %v2791_v13 = vld [vmem:[%s3215_s22] sm:$0xff]   ;;  %2475 = vmatprep.mubr.bf16.mxu0 %v2790_v12  ;;  %v2787_v15 = vld [vmem:[%s3223_s7 + $0x8] sm:$0xff]   ;;  %v2794_v19 = vld [vmem:[%s3223_s7 + $0xb8] sm:$0xff]   ;;  %s2970_s14 = sshll.u32 %s3058_s11, 4  ;;  %s2971_s14 = int_to_ptr.vmem [resolvable:$false] %s2970_s14 }
  0x5b   : > { %2462 = vmatpush3.bf16.msra.mxu0 %v2776_v2  ;;  %2499 = vmatprep.mubr.bf16.mxu1 %v2791_v13  ;;  %v2788_v16 = vld [vmem:[%s3223_s7 + $0x40] sm:$0xff]   ;;  %v2792_v18 = vld [vmem:[%s3215_s22 + $0x28] sm:$0xff]   ;;  %v2795_v20 = vld [vmem:[%s3223_s7 + $0xf8] sm:$0xff]   ;;  %p2968_p13 = pnand %p2967_p8, %p3133_p9  ;;  %s2972_s30 = scalar_lea.vmem %s2971_s14, 1024 }
  0x5c   : > { %2486 = vmatpush3.bf16.msra.mxu1 %v2777_v3  ;;  %2463 = vmatprep.subr.bf16.mxu0 %v2778_v4  ;;  %v2789_v17 = vld [vmem:[%s3223_s7] sm:$0xff]   ;;  %v2793_v21 = vld [vmem:[%s3215_s22 + $0x8] sm:$0xff]   ;;  %v2796_v22 = vld [vmem:[%s3223_s7 + $0xb0] sm:$0xff]   ;;  %p2973_p3 = scmp.lt.s32.totalorder %s3352_s6, %s2971_s14  ;;  %p2974_p10 = scmp.lt.s32.totalorder %s2972_s30, %s2966_s8 }
  0x5d   : > { %2487 = vmatprep.subr.bf16.mxu1 %v2779_v5  ;;  %v2797_v23 = vld [vmem:[%s3223_s7 + $0xf0] sm:$0xff]   ;;  %v2798_v26 = vld [vmem:[%s3223_s7 + $0xa8] sm:$0xff]   ;;  %v2800_v28 = vld [vmem:[%s3223_s7 + $0xa0] sm:$0xff]   ;;  %p2969_p2 = pneg %p2968_p13 }
  0x5e   : > { %v2804_v24 = vld [vmem:[%s3215_s22 + $0x30] sm:$0xff]   ;;  %v2799_v27 = vld [vmem:[%s3223_s7 + $0xe8] sm:$0xff]   ;;  %v2806_v29 = vld [vmem:[%s3215_s22 + $0x38] sm:$0xff]   ;;  %p2975_p12 = por %p2974_p10, %p2973_p3 }
  0x5f   : > { %2464 = vmatpush3.bf16.msra.mxu0 %v2778_v4  ;;  %v2805_v25 = vld [vmem:[%s3215_s22 + $0x10] sm:$0xff]   ;;  %v2807_v30 = vld [vmem:[%s3215_s22 + $0x18] sm:$0xff]   ;;  %v2801_v31 = vld [vmem:[%s3223_s7 + $0xe0] sm:$0xff]  }
  0x60   : > { %2488 = vmatpush3.bf16.msra.mxu1 %v2779_v5  ;;  %2465 = vmatprep.subr.bf16.mxu0 %v2780_v6  ;;  %v2814_v32 = vld [vmem:[%s3215_s22 + $0x40] sm:$0xff]   ;;  %v2802_v34 = vld [vmem:[%s3223_s7 + $0x98] sm:$0xff]   ;;  %v2808_v36 = vld [vmem:[%s3223_s7 + $0x90] sm:$0xff]   ;;  %p2976_p0 = pnand %p2975_p12, %p2969_p2 }
  0x61   : > { %2489 = vmatprep.subr.bf16.mxu1 %v2781_v7  ;;  %v2815_v33 = vld [vmem:[%s3215_s22 + $0x60] sm:$0xff]   ;;  %v2803_v35 = vld [vmem:[%s3223_s7 + $0xd8] sm:$0xff]   ;;  %v2809_v37 = vld [vmem:[%s3223_s7 + $0xd0] sm:$0xff]  }
  0x62   : > { %v2810_v38 = vld [vmem:[%s3223_s7 + $0x88] sm:$0xff]   ;;  %v2812_v40 = vld [vmem:[%s3223_s7 + $0x80] sm:$0xff]   ;;  %v2818_v43 = vld [vmem:[%s3223_s7 + $0x138] sm:$0xff]  }
  0x63   : > { %2466 = vmatpush3.bf16.msra.mxu0 %v2780_v6  ;;  %v2811_v39 = vld [vmem:[%s3223_s7 + $0xc8] sm:$0xff]   ;;  %v2813_v41 = vld [vmem:[%s3223_s7 + $0xc0] sm:$0xff]   ;;  %v2819_v44 = vld [vmem:[%s3223_s7 + $0x178] sm:$0xff]  }
  0x64   : > { %2490 = vmatpush3.bf16.msra.mxu1 %v2781_v7  ;;  %2467 = vmatprep.subr.bf16.mxu0 %v2782_v8  ;;  %v2816_v42 = vld [vmem:[%s3215_s22 + $0x48] sm:$0xff]   ;;  %v2820_v46 = vld [vmem:[%s3223_s7 + $0x130] sm:$0xff]   ;;  %v2823_v50 = vld [vmem:[%s3215_s22 + $0x58] sm:$0xff]  }
  0x65   : > { %2491 = vmatprep.subr.bf16.mxu1 %v2783_v9  ;;  %v2817_v45 = vld [vmem:[%s3215_s22 + $0x68] sm:$0xff]   ;;  %v2821_v47 = vld [vmem:[%s3223_s7 + $0x170] sm:$0xff]   ;;  %v2827_v53 = vld [vmem:[%s3215_s22 + $0x78] sm:$0xff]  }
  0x66   : > { %v2822_v48 = vld [vmem:[%s3215_s22 + $0x50] sm:$0xff]   ;;  %v2824_v51 = vld [vmem:[%s3223_s7 + $0x128] sm:$0xff]   ;;  %v2828_v54 = vld [vmem:[%s3223_s7 + $0x120] sm:$0xff]  }
  0x67   : > { %2468 = vmatpush3.bf16.msra.mxu0 %v2782_v8  ;;  %v2826_v49 = vld [vmem:[%s3215_s22 + $0x70] sm:$0xff]   ;;  %v2825_v52 = vld [vmem:[%s3223_s7 + $0x168] sm:$0xff]   ;;  %v2829_v55 = vld [vmem:[%s3223_s7 + $0x160] sm:$0xff]  }
  0x68   : > { %2492 = vmatpush3.bf16.msra.mxu1 %v2783_v9  ;;  %2469 = vmatprep.subr.bf16.mxu0 %v2784_v10  ;;  %v2838_v56 = vld [vmem:[%s3215_s22 + $0x80] sm:$0xff]   ;;  %v2830_v58 = vld [vmem:[%s3223_s7 + $0x118] sm:$0xff]   ;;  %v2832_v60 = vld [vmem:[%s3223_s7 + $0x110] sm:$0xff]  }
  0x69   : > { %2493 = vmatprep.subr.bf16.mxu1 %v2785_v11  ;;  %v2839_v57 = vld [vmem:[%s3215_s22 + $0xa0] sm:$0xff]   ;;  %v2831_v59 = vld [vmem:[%s3223_s7 + $0x158] sm:$0xff]   ;;  %v2833_v61 = vld [vmem:[%s3223_s7 + $0x150] sm:$0xff]  }
  0x6a   : > { %v2834_v62 = vld [vmem:[%s3223_s7 + $0x108] sm:$0xff]   ;;  %v2836_v0 = vld [vmem:[%s3223_s7 + $0x100] sm:$0xff]   ;;  %v2842_v3 = vld [vmem:[%s3223_s7 + $0x1b8] sm:$0xff]  }
  0x6b   : > { %2470 = vmatpush3.bf16.msra.mxu0 %v2784_v10  ;;  %v2835_v63 = vld [vmem:[%s3223_s7 + $0x148] sm:$0xff]   ;;  %v2837_v1 = vld [vmem:[%s3223_s7 + $0x140] sm:$0xff]   ;;  %v2843_v4 = vld [vmem:[%s3223_s7 + $0x1f8] sm:$0xff]  }
  0x6c   : > { %2494 = vmatpush3.bf16.msra.mxu1 %v2785_v11  ;;  %2471 = vmatprep.subr.bf16.mxu0 %v2786_v14  ;;  %v2840_v2 = vld [vmem:[%s3215_s22 + $0x88] sm:$0xff]   ;;  %v2844_v6 = vld [vmem:[%s3223_s7 + $0x1b0] sm:$0xff]   ;;  %v2847_v10 = vld [vmem:[%s3215_s22 + $0x98] sm:$0xff]  }
  0x6d   : > { %2495 = vmatprep.subr.bf16.mxu1 %v2787_v15  ;;  %v2841_v5 = vld [vmem:[%s3215_s22 + $0xa8] sm:$0xff]   ;;  %v2845_v7 = vld [vmem:[%s3223_s7 + $0x1f0] sm:$0xff]   ;;  %v2851_v13 = vld [vmem:[%s3215_s22 + $0xb8] sm:$0xff]  }
  0x6e   : > { %v2846_v8 = vld [vmem:[%s3215_s22 + $0x90] sm:$0xff]   ;;  %v2848_v11 = vld [vmem:[%s3223_s7 + $0x1a8] sm:$0xff]  }
  0x6f   : > { %2472 = vmatpush3.bf16.msra.mxu0 %v2786_v14  ;;  %v2850_v9 = vld [vmem:[%s3215_s22 + $0xb0] sm:$0xff]   ;;  %v2849_v12 = vld [vmem:[%s3223_s7 + $0x1e8] sm:$0xff]   ;;  %v2852_v14 = vld [vmem:[%s3223_s7 + $0x1a0] sm:$0xff]  }
  0x70   : > { %2496 = vmatpush3.bf16.msra.mxu1 %v2787_v15  ;;  %2473 = vmatprep.subr.bf16.mxu0 %v2788_v16  ;;  %v2853_v15 = vld [vmem:[%s3223_s7 + $0x1e0] sm:$0xff]  }
  0x71   : > { %2497 = vmatprep.subr.bf16.mxu1 %v2789_v17 }
  0x73   : > { %2474 = vmatpush3.bf16.msra.mxu0 %v2788_v16  ;;  %v2862_v16 = vld [vmem:[%s3215_s22 + $0xc0] sm:$0xff]  }
  0x74   : > { %2498 = vmatpush3.bf16.msra.mxu1 %v2789_v17  ;;  %2507 = vmatprep.subr.bf16.mxu0 %v2794_v19  ;;  %v2863_v17 = vld [vmem:[%s3215_s22 + $0xe0] sm:$0xff]  }
  0x75   : > { %2531 = vmatprep.subr.bf16.mxu1 %v2795_v20 }
  0x76   : > { %2476 = vmatmul.mubr.bf16.vlgmr.msra.gmra.mxu0 %v2792_v18  ;;  %v2854_v18 = vld [vmem:[%s3223_s7 + $0x198] sm:$0xff]  }
  0x77   : > { %2500 = vmatmul.mubr.bf16.vlgmr.msra.gmra.mxu1 %v2793_v21  ;;  %2508 = vmatpush3.bf16.msra.mxu0 %v2794_v19  ;;  %v2855_v19 = vld [vmem:[%s3223_s7 + $0x1d8] sm:$0xff]   ;;  %v2857_v21 = vld [vmem:[%s3223_s7 + $0x1d0] sm:$0xff]  }
  0x78   : > { %2532 = vmatpush3.bf16.msra.mxu1 %v2795_v20  ;;  %2509 = vmatprep.subr.bf16.mxu0 %v2796_v22  ;;  %v2856_v20 = vld [vmem:[%s3223_s7 + $0x190] sm:$0xff]  }
  0x79   : > { %2533 = vmatprep.subr.bf16.mxu1 %v2797_v23  ;;  %2479 = vmatprep.mubr.bf16.mxu0 %v2804_v24  ;;  %v2860_v24 = vld [vmem:[%s3223_s7 + $0x180] sm:$0xff]  }
  0x7a   : > { %2503 = vmatprep.mubr.bf16.mxu1 %v2805_v25  ;;  %v2861_v25 = vld [vmem:[%s3223_s7 + $0x1c0] sm:$0xff]  }
  0x7b   : > { %2510 = vmatpush3.bf16.msra.mxu0 %v2796_v22  ;;  %v2858_v22 = vld [vmem:[%s3223_s7 + $0x188] sm:$0xff]  }
  0x7c   : > { %2534 = vmatpush3.bf16.msra.mxu1 %v2797_v23  ;;  %2511 = vmatprep.subr.bf16.mxu0 %v2798_v26  ;;  %v2859_v23 = vld [vmem:[%s3223_s7 + $0x1c8] sm:$0xff]  }
  0x7d   : > { %2535 = vmatprep.subr.bf16.mxu1 %v2799_v27 }
  0x7e   : > { %2480 = vmatmul.mubr.bf16.gmra.mxu0 %v2806_v29  ;;  %v2867_v29 = vld [vmem:[%s3223_s7 + $0x230] sm:$0xff]  }
  0x7f   : > { %2512 = vmatpush3.bf16.msra.mxu0 %v2798_v26  ;;  %2504 = vmatmul.mubr.bf16.gmra.mxu1 %v2807_v30  ;;  %v2866_v26 = vld [vmem:[%s3223_s7 + $0x238] sm:$0xff]   ;;  %v2868_v30 = vld [vmem:[%s3215_s22 + $0xd0] sm:$0xff]  }
  0x80   : > { %2536 = vmatpush3.bf16.msra.mxu1 %v2799_v27  ;;  %2513 = vmatprep.subr.bf16.mxu0 %v2800_v28  ;;  %v2864_v27 = vld [vmem:[%s3215_s22 + $0xc8] sm:$0xff]  }
  0x81   : > { %2537 = vmatprep.subr.bf16.mxu1 %v2801_v31  ;;  %2523 = vmatprep.mubr.bf16.mxu0 %v2814_v32  ;;  %v2870_v32 = vld [vmem:[%s3223_s7 + $0x228] sm:$0xff]  }
  0x82   : > { %2547 = vmatprep.mubr.bf16.mxu1 %v2815_v33  ;;  %v2869_v33 = vld [vmem:[%s3215_s22 + $0xd8] sm:$0xff]  }
  0x83   : > { %2514 = vmatpush3.bf16.msra.mxu0 %v2800_v28  ;;  %v2865_v28 = vld [vmem:[%s3215_s22 + $0xe8] sm:$0xff]  }
  0x84   : > { %2538 = vmatpush3.bf16.msra.mxu1 %v2801_v31  ;;  %2515 = vmatprep.subr.bf16.mxu0 %v2802_v34  ;;  %v2871_v31 = vld [vmem:[%s3215_s22 + $0xf0] sm:$0xff]  }
  0x85   : > { %2539 = vmatprep.subr.bf16.mxu1 %v2803_v35 }
  0x87   : > { %2516 = vmatpush3.bf16.msra.mxu0 %v2802_v34  ;;  %v2872_v34 = vld [vmem:[%s3215_s22 + $0xf8] sm:$0xff]  }
  0x88   : > { %2540 = vmatpush3.bf16.msra.mxu1 %v2803_v35  ;;  %2517 = vmatprep.subr.bf16.mxu0 %v2808_v36  ;;  %v2873_v35 = vld [vmem:[%s3223_s7 + $0x220] sm:$0xff]  }
  0x89   : > { %2541 = vmatprep.subr.bf16.mxu1 %v2809_v37 }
  0x8b   : > { %2518 = vmatpush3.bf16.msra.mxu0 %v2808_v36  ;;  %v2878_v36 = vld [vmem:[%s3215_s22 + $0x100] sm:$0xff]  }
  0x8c   : > { %2542 = vmatpush3.bf16.msra.mxu1 %v2809_v37  ;;  %2519 = vmatprep.subr.bf16.mxu0 %v2810_v38  ;;  %v2879_v37 = vld [vmem:[%s3215_s22 + $0x110] sm:$0xff]  }
  0x8d   : > { %2543 = vmatprep.subr.bf16.mxu1 %v2811_v39 }
  0x8f   : > { %2520 = vmatpush3.bf16.msra.mxu0 %v2810_v38  ;;  %v2874_v38 = vld [vmem:[%s3223_s7 + $0x218] sm:$0xff]  }
  0x90   : > { %2544 = vmatpush3.bf16.msra.mxu1 %v2811_v39  ;;  %2521 = vmatprep.subr.bf16.mxu0 %v2812_v40  ;;  %v2875_v39 = vld [vmem:[%s3223_s7 + $0x210] sm:$0xff]  }
  0x91   : > { %2545 = vmatprep.subr.bf16.mxu1 %v2813_v41 }
  0x93   : > { %2522 = vmatpush3.bf16.msra.mxu0 %v2812_v40  ;;  %v2876_v40 = vld [vmem:[%s3223_s7 + $0x208] sm:$0xff]  }
  0x94   : > { %2546 = vmatpush3.bf16.msra.mxu1 %v2813_v41  ;;  %2555 = vmatprep.subr.bf16.mxu0 %v2818_v43  ;;  %v2877_v41 = vld [vmem:[%s3223_s7 + $0x200] sm:$0xff]  }
  0x95   : > { %2579 = vmatprep.subr.bf16.mxu1 %v2819_v44 }
  0x96   : > { %2524 = vmatmul.mubr.bf16.vlgmr.msra.gmra.mxu0 %v2816_v42  ;;  %v2880_v42 = vld [vmem:[%s3215_s22 + $0x108] sm:$0xff]  }
  0x97   : > { %2548 = vmatmul.mubr.bf16.vlgmr.msra.gmra.mxu1 %v2817_v45  ;;  %2556 = vmatpush3.bf16.msra.mxu0 %v2818_v43  ;;  %v2881_v43 = vld [vmem:[%s3215_s22 + $0x118] sm:$0xff]  }
  0x98   : > { %2580 = vmatpush3.bf16.msra.mxu1 %v2819_v44  ;;  %2557 = vmatprep.subr.bf16.mxu0 %v2820_v46 }
  0x99   : > { %2581 = vmatprep.subr.bf16.mxu1 %v2821_v47  ;;  %2527 = vmatprep.mubr.bf16.mxu0 %v2822_v48 }
  0x9a   : > { %2551 = vmatprep.mubr.bf16.mxu1 %v2826_v49 }
  0x9b   : > { %2558 = vmatpush3.bf16.msra.mxu0 %v2820_v46 }
  0x9c   : > { %2582 = vmatpush3.bf16.msra.mxu1 %v2821_v47  ;;  %2559 = vmatprep.subr.bf16.mxu0 %v2824_v51 }
  0x9d   : > { %2583 = vmatprep.subr.bf16.mxu1 %v2825_v52 }
  0x9e   : > { %2528 = vmatmul.mubr.bf16.gmra.mxu0 %v2823_v50 }
  0x9f   : > { %2560 = vmatpush3.bf16.msra.mxu0 %v2824_v51  ;;  %2552 = vmatmul.mubr.bf16.gmra.mxu1 %v2827_v53 }
  0xa0   : > { %2584 = vmatpush3.bf16.msra.mxu1 %v2825_v52  ;;  %2561 = vmatprep.subr.bf16.mxu0 %v2828_v54 }
  0xa1   : > { %2585 = vmatprep.subr.bf16.mxu1 %v2829_v55  ;;  %2571 = vmatprep.mubr.bf16.mxu0 %v2838_v56 }
  0xa2   : > { %2595 = vmatprep.mubr.bf16.mxu1 %v2839_v57 }
  0xa3   : > { %2562 = vmatpush3.bf16.msra.mxu0 %v2828_v54 }
  0xa4   : > { %2586 = vmatpush3.bf16.msra.mxu1 %v2829_v55  ;;  %2563 = vmatprep.subr.bf16.mxu0 %v2830_v58 }
  0xa5   : > { %2587 = vmatprep.subr.bf16.mxu1 %v2831_v59 }
  0xa7   : > { %2564 = vmatpush3.bf16.msra.mxu0 %v2830_v58 }
  0xa8   : > { %2588 = vmatpush3.bf16.msra.mxu1 %v2831_v59  ;;  %2565 = vmatprep.subr.bf16.mxu0 %v2832_v60 }
  0xa9   : > { %2589 = vmatprep.subr.bf16.mxu1 %v2833_v61 }
  0xab   : > { %2566 = vmatpush3.bf16.msra.mxu0 %v2832_v60 }
  0xac   : > { %2590 = vmatpush3.bf16.msra.mxu1 %v2833_v61  ;;  %2567 = vmatprep.subr.bf16.mxu0 %v2834_v62 }
  0xad   : > { %2591 = vmatprep.subr.bf16.mxu1 %v2835_v63 }
  0xaf   : > { %2568 = vmatpush3.bf16.msra.mxu0 %v2834_v62 }
  0xb0   : > { %2592 = vmatpush3.bf16.msra.mxu1 %v2835_v63  ;;  %2569 = vmatprep.subr.bf16.mxu0 %v2836_v0 }
  0xb1   : > { %2593 = vmatprep.subr.bf16.mxu1 %v2837_v1 }
  0xb3   : > { %2570 = vmatpush3.bf16.msra.mxu0 %v2836_v0 }
  0xb4   : > { %2594 = vmatpush3.bf16.msra.mxu1 %v2837_v1  ;;  %2603 = vmatprep.subr.bf16.mxu0 %v2842_v3 }
  0xb5   : > { %2627 = vmatprep.subr.bf16.mxu1 %v2843_v4 }
  0xb6   : > { %2572 = vmatmul.mubr.bf16.vlgmr.msra.gmra.mxu0 %v2840_v2 }
  0xb7   : > { %2596 = vmatmul.mubr.bf16.vlgmr.msra.gmra.mxu1 %v2841_v5  ;;  %2604 = vmatpush3.bf16.msra.mxu0 %v2842_v3 }
  0xb8   : > { %2628 = vmatpush3.bf16.msra.mxu1 %v2843_v4  ;;  %2605 = vmatprep.subr.bf16.mxu0 %v2844_v6 }
  0xb9   : > { %2629 = vmatprep.subr.bf16.mxu1 %v2845_v7  ;;  %2575 = vmatprep.mubr.bf16.mxu0 %v2846_v8 }
  0xba   : > { %2599 = vmatprep.mubr.bf16.mxu1 %v2850_v9 }
  0xbb   : > { %2606 = vmatpush3.bf16.msra.mxu0 %v2844_v6 }
  0xbc   : > { %2630 = vmatpush3.bf16.msra.mxu1 %v2845_v7  ;;  %2607 = vmatprep.subr.bf16.mxu0 %v2848_v11 }
  0xbd   : > { %2631 = vmatprep.subr.bf16.mxu1 %v2849_v12 }
  0xbe   : > { %2576 = vmatmul.mubr.bf16.gmra.mxu0 %v2847_v10 }
  0xbf   : > { %2608 = vmatpush3.bf16.msra.mxu0 %v2848_v11  ;;  %2600 = vmatmul.mubr.bf16.gmra.mxu1 %v2851_v13 }
  0xc0   : > { %2632 = vmatpush3.bf16.msra.mxu1 %v2849_v12  ;;  %2609 = vmatprep.subr.bf16.mxu0 %v2852_v14 }
  0xc1   : > { %2633 = vmatprep.subr.bf16.mxu1 %v2853_v15  ;;  %2619 = vmatprep.mubr.bf16.mxu0 %v2862_v16 }
  0xc2   : > { %2643 = vmatprep.mubr.bf16.mxu1 %v2863_v17 }
  0xc3   : > { %2610 = vmatpush3.bf16.msra.mxu0 %v2852_v14 }
  0xc4   : > { %2634 = vmatpush3.bf16.msra.mxu1 %v2853_v15  ;;  %2611 = vmatprep.subr.bf16.mxu0 %v2854_v18 }
  0xc5   : > { %2635 = vmatprep.subr.bf16.mxu1 %v2855_v19 }
  0xc7   : > { %2612 = vmatpush3.bf16.msra.mxu0 %v2854_v18 }
  0xc8   : > { %2636 = vmatpush3.bf16.msra.mxu1 %v2855_v19  ;;  %2613 = vmatprep.subr.bf16.mxu0 %v2856_v20 }
  0xc9   : > { %2637 = vmatprep.subr.bf16.mxu1 %v2857_v21 }
  0xcb   : > { %2614 = vmatpush3.bf16.msra.mxu0 %v2856_v20 }
  0xcc   : > { %2638 = vmatpush3.bf16.msra.mxu1 %v2857_v21  ;;  %2615 = vmatprep.subr.bf16.mxu0 %v2858_v22 }
  0xcd   : > { %2639 = vmatprep.subr.bf16.mxu1 %v2859_v23 }
  0xcf   : > { %2616 = vmatpush3.bf16.msra.mxu0 %v2858_v22 }
  0xd0   : > { %2640 = vmatpush3.bf16.msra.mxu1 %v2859_v23  ;;  %2617 = vmatprep.subr.bf16.mxu0 %v2860_v24 }
  0xd1   : > { %2641 = vmatprep.subr.bf16.mxu1 %v2861_v25 }
  0xd3   : > { %2618 = vmatpush3.bf16.msra.mxu0 %v2860_v24 }
  0xd4   : > { %2642 = vmatpush3.bf16.msra.mxu1 %v2861_v25  ;;  %2651 = vmatprep.subr.bf16.mxu0 %v2866_v26 }
  0xd5   : > { %2675 = vmatprep.subr.bf16.mxu1 %v2866_v26 }
  0xd6   : > { %2620 = vmatmul.mubr.bf16.vlgmr.msra.gmra.mxu0 %v2864_v27 }
  0xd7   : > { %2644 = vmatmul.mubr.bf16.vlgmr.msra.gmra.mxu1 %v2865_v28  ;;  %2652 = vmatpush3.bf16.msra.mxu0 %v2866_v26 }
  0xd8   : > { %2683 = vmatpush3.bf16.msra.mxu1 %v2866_v26  ;;  %2653 = vmatprep.subr.bf16.mxu0 %v2867_v29 }
  0xd9   : > { %2676 = vmatprep.subr.bf16.mxu1 %v2867_v29  ;;  %2623 = vmatprep.mubr.bf16.mxu0 %v2868_v30 }
  0xda   : > { %2647 = vmatprep.mubr.bf16.mxu1 %v2871_v31 }
  0xdb   : > { %2654 = vmatpush3.bf16.msra.mxu0 %v2867_v29 }
  0xdc   : > { %2684 = vmatpush3.bf16.msra.mxu1 %v2867_v29  ;;  %2655 = vmatprep.subr.bf16.mxu0 %v2870_v32 }
  0xdd   : > { %2677 = vmatprep.subr.bf16.mxu1 %v2870_v32 }
  0xde   : > { %2624 = vmatmul.mubr.bf16.gmra.mxu0 %v2869_v33 }
  0xdf   : > { %2656 = vmatpush3.bf16.msra.mxu0 %v2870_v32  ;;  %2648 = vmatmul.mubr.bf16.gmra.mxu1 %v2872_v34 }
  0xe0   : > { %2685 = vmatpush3.bf16.msra.mxu1 %v2870_v32  ;;  %2657 = vmatprep.subr.bf16.mxu0 %v2873_v35 }
  0xe1   : > { %2678 = vmatprep.subr.bf16.mxu1 %v2873_v35  ;;  %2667 = vmatprep.mubr.bf16.mxu0 %v2878_v36 }
  0xe2   : > { %2671 = vmatprep.mubr.bf16.mxu1 %v2879_v37 }
  0xe3   : > { %2658 = vmatpush3.bf16.msra.mxu0 %v2873_v35 }
  0xe4   : > { %2686 = vmatpush3.bf16.msra.mxu1 %v2873_v35  ;;  %2659 = vmatprep.subr.bf16.mxu0 %v2874_v38 }
  0xe5   : > { %2679 = vmatprep.subr.bf16.mxu1 %v2874_v38 }
  0xe7   : > { %2660 = vmatpush3.bf16.msra.mxu0 %v2874_v38 }
  0xe8   : > { %2687 = vmatpush3.bf16.msra.mxu1 %v2874_v38  ;;  %2661 = vmatprep.subr.bf16.mxu0 %v2875_v39 }
  0xe9   : > { %2680 = vmatprep.subr.bf16.mxu1 %v2875_v39 }
  0xeb   : > { %2662 = vmatpush3.bf16.msra.mxu0 %v2875_v39 }
  0xec   : > { %2688 = vmatpush3.bf16.msra.mxu1 %v2875_v39  ;;  %2663 = vmatprep.subr.bf16.mxu0 %v2876_v40 }
  0xed   : > { %2681 = vmatprep.subr.bf16.mxu1 %v2876_v40 }
  0xef   : > { %2664 = vmatpush3.bf16.msra.mxu0 %v2876_v40 }
  0xf0   : > { %2689 = vmatpush3.bf16.msra.mxu1 %v2876_v40  ;;  %2665 = vmatprep.subr.bf16.mxu0 %v2877_v41 }
  0xf1   : > { %2682 = vmatprep.subr.bf16.mxu1 %v2877_v41 }
  0xf3   : > { %2666 = vmatpush3.bf16.msra.mxu0 %v2877_v41 }
  0xf4   : > { %2690 = vmatpush3.bf16.msra.mxu1 %v2877_v41 }
  0xf6   : > { %2668 = vmatmul.mubr.bf16.vlgmr.msra.gmra.mxu0 %v2880_v42 }
  0xf7   : > { %2672 = vmatmul.mubr.bf16.vlgmr.msra.gmra.mxu1 %v2881_v43 }
 0x136   : > { %v2477_v44 = vpop.f32.mrf.mxu0 }
 0x137   : > { %v2501_v46 = vpop.f32.mrf.mxu1 }
 0x138   : > { %v437_v45 = vpop.f32.mrf.mxu0  ;;  %v583_v35 = vadd.f32 %v2501_v46, %v2477_v44 }
 0x139   : > { %v574_v48 = vpop.f32.mrf.mxu1 }
 0x13a   : > { %v2478_v47 = vpop.f32.mrf.mxu0  ;;  %v575_v37 = vadd.f32 %v574_v48, %v437_v45 }
 0x13b   : > { %v2502_v51 = vpop.f32.mrf.mxu1 }
 0x13c   : > { %v440_v49 = vpop.f32.mrf.mxu0  ;;  %v586_v38 = vadd.f32 %v2502_v51, %v2478_v47 }
 0x13d   : > { %v577_v53 = vpop.f32.mrf.mxu1 }
 0x13e   : > { %v2481_v50 = vpop.f32.mrf.mxu0 }
 0x13f   : > { %v2505_v54 = vpop.f32.mrf.mxu1 }
 0x140   : > { %v453_v52 = vpop.f32.mrf.mxu0  ;;  %v599_v36 = vadd.f32 %v2505_v54, %v2481_v50 }
 0x141   : > { %v590_v56 = vpop.f32.mrf.mxu1 }
 0x142   : > { %v2482_v55 = vpop.f32.mrf.mxu0  ;;  %v591_v41 = vadd.f32 %v590_v56, %v453_v52 }
 0x143   : > { %v2506_v59 = vpop.f32.mrf.mxu1 }
 0x144   : > { %v456_v57 = vpop.f32.mrf.mxu0  ;;  %v602_v42 = vadd.f32 %v2506_v59, %v2482_v55 }
 0x145   : > { %v593_v61 = vpop.f32.mrf.mxu1 }
 0x146   : > { %v594_v50 = vadd.f32 %v593_v61, %v456_v57 }
 0x156   : > { %v2525_v58 = vpop.f32.mrf.mxu0 }
 0x157   : > { %v2549_v62 = vpop.f32.mrf.mxu1  ;;  %v770_v39 = vadd.f32 %v2525_v58, %v583_v35 }
 0x158   : > { %v737_v60 = vpop.f32.mrf.mxu0 }
 0x159   : > { %v908_v0 = vpop.f32.mrf.mxu1  ;;  %v941_v48 = vadd.f32 %v2549_v62, %v770_v39 }
 0x15a   : > { %v2526_v63 = vpop.f32.mrf.mxu0 }
 0x15b   : > { %v2550_v2 = vpop.f32.mrf.mxu1  ;;  %v771_v44 = vadd.f32 %v2526_v63, %v586_v38 }
 0x15c   : > { %v740_v1 = vpop.f32.mrf.mxu0 }
 0x15d   : > { %v911_v4 = vpop.f32.mrf.mxu1  ;;  %v942_v52 = vadd.f32 %v2550_v2, %v771_v44 }
 0x15e   : > { %v2529_v3 = vpop.f32.mrf.mxu0 }
 0x15f   : > { %v2553_v6 = vpop.f32.mrf.mxu1  ;;  %v774_v43 = vadd.f32 %v2529_v3, %v599_v36 }
 0x160   : > { %v753_v5 = vpop.f32.mrf.mxu0 }
 0x161   : > { %v924_v8 = vpop.f32.mrf.mxu1  ;;  %v772_v54 = vadd.f32 %v753_v5, %v591_v41  ;;  %v945_v51 = vadd.f32 %v2553_v6, %v774_v43 }
 0x162   : > { %v2530_v7 = vpop.f32.mrf.mxu0 }
 0x163   : > { %v2554_v10 = vpop.f32.mrf.mxu1  ;;  %v775_v45 = vadd.f32 %v2530_v7, %v602_v42  ;;  %v943_v59 = vadd.f32 %v924_v8, %v772_v54 }
 0x164   : > { %v756_v9 = vpop.f32.mrf.mxu0 }
 0x165   : > { %v927_v12 = vpop.f32.mrf.mxu1  ;;  %v773_v35 = vadd.f32 %v756_v9, %v594_v50  ;;  %v946_v3 = vadd.f32 %v2554_v10, %v775_v45 }
 0x167   : > { %v944_v63 = vadd.f32 %v927_v12, %v773_v35 }
 0x176   : > { %v2573_v11 = vpop.f32.mrf.mxu0 }
 0x177   : > { %v2597_v14 = vpop.f32.mrf.mxu1  ;;  %v1112_v56 = vadd.f32 %v2573_v11, %v941_v48 }
 0x178   : > { %v1079_v13 = vpop.f32.mrf.mxu0 }
 0x179   : > { %v1250_v16 = vpop.f32.mrf.mxu1  ;;  %v1283_v5 = vadd.f32 %v2597_v14, %v1112_v56 }
 0x17a   : > { %v2574_v15 = vpop.f32.mrf.mxu0 }
 0x17b   : > { %v2598_v18 = vpop.f32.mrf.mxu1 }
 0x17c   : > { %v1082_v17 = vpop.f32.mrf.mxu0 }
 0x17d   : > { %v3337_v20 = vpop.f32.mrf.mxu1 }
 0x17e   : > { %v2577_v19 = vpop.f32.mrf.mxu0  ;;  %3424 = vst [vmem:[#allocation15_spill] sm:$0xff] %v3337_v20 }
 0x17f   : > { %v2601_v21 = vpop.f32.mrf.mxu1  ;;  %v1116_v36 = vadd.f32 %v2577_v19, %v945_v51 }
 0x180   : > { %v1095_v22 = vpop.f32.mrf.mxu0 }
 0x181   : > { %v1266_v23 = vpop.f32.mrf.mxu1  ;;  %v1287_v6 = vadd.f32 %v2601_v21, %v1116_v36 }
 0x182   : > { %v2578_v24 = vpop.f32.mrf.mxu0 }
 0x183   : > { %v2602_v25 = vpop.f32.mrf.mxu1  ;;  %v1117_v57 = vadd.f32 %v2578_v24, %v946_v3 }
 0x184   : > { %v1098_v26 = vpop.f32.mrf.mxu0 }
 0x185   : > { %v1269_v28 = vpop.f32.mrf.mxu1  ;;  %v1115_v7 = vadd.f32 %v1098_v26, %v944_v63  ;;  %v1288_v8 = vadd.f32 %v2602_v25, %v1117_v57 }
 0x187   : > { %v1286_v24 = vadd.f32 %v1269_v28, %v1115_v7  ;;  %v2307_v28 = vld [vmem:[%s246_s23] ss:$0 sm:$0xff] }
 0x196   : > { %v2621_v27 = vpop.f32.mrf.mxu0 }
 0x197   : > { %v2645_v29 = vpop.f32.mrf.mxu1  ;;  %v1454_v2 = vadd.f32 %v2621_v27, %v1283_v5 }
 0x198   : > { %v1421_v30 = vpop.f32.mrf.mxu0 }
 0x199   : > { %v3339_v31 = vpop.f32.mrf.mxu1  ;;  %v1625_v21 = vadd.f32 %v2645_v29, %v1454_v2 }
 0x19a   : > { %3425 = vst [vmem:[#allocation16_spill] sm:$0xff] %v3339_v31  ;;  %v2622_v32 = vpop.f32.mrf.mxu0  ;;  %v578_v31 = vadd.f32 %v577_v53, %v440_v49 }
 0x19b   : > { %v3341_v33 = vpop.f32.mrf.mxu1 }
 0x19c   : > { %3426 = vst [vmem:[#allocation17_spill] sm:$0xff] %v3341_v33  ;;  %v1424_v34 = vpop.f32.mrf.mxu0  ;;  %v768_v33 = vadd.f32 %v737_v60, %v575_v37  ;;  %v769_v47 = vadd.f32 %v740_v1, %v578_v31  ;;  %v1113_v60 = vadd.f32 %v2574_v15, %v942_v52  ;;  %v1114_v37 = vadd.f32 %v1095_v22, %v943_v59 }
 0x19d   : > { %v3343_v40 = vpop.f32.mrf.mxu1 }
 0x19e   : > { %3427 = vst [vmem:[#allocation18_spill] sm:$0xff] %v3343_v40  ;;  %v2625_v20 = vpop.f32.mrf.mxu0  ;;  %v939_v40 = vadd.f32 %v908_v0, %v768_v33  ;;  %v940_v49 = vadd.f32 %v911_v4, %v769_v47  ;;  %v1284_v0 = vadd.f32 %v2598_v18, %v1113_v60  ;;  %v1285_v11 = vadd.f32 %v1266_v23, %v1114_v37  ;;  %v3428_v4 = vld [vmem:[#allocation15_spill] sm:$0xff] }
 0x19f   : > { %v2649_v46 = vpop.f32.mrf.mxu1  ;;  %v1458_v10 = vadd.f32 %v2625_v20, %v1287_v6 }
 0x1a0   : > { %v1437_v58 = vpop.f32.mrf.mxu0  ;;  %v1110_v53 = vadd.f32 %v1079_v13, %v939_v40  ;;  %v1111_v62 = vadd.f32 %v1082_v17, %v940_v49  ;;  %v1455_v12 = vadd.f32 %v2622_v32, %v1284_v0 }
 0x1a1   : > { %v1608_v55 = vpop.f32.mrf.mxu1  ;;  %v1456_v31 = vadd.f32 %v1437_v58, %v1285_v11  ;;  %v1629_v18 = vadd.f32 %v2649_v46, %v1458_v10  ;;  %v3429_v25 = vld [vmem:[#allocation16_spill] sm:$0xff] }
 0x1a2   : > { %v2626_v61 = vpop.f32.mrf.mxu0  ;;  %v1281_v9 = vadd.f32 %v1250_v16, %v1110_v53  ;;  %v1282_v13 = vadd.f32 %v3428_v4, %v1111_v62 }
 0x1a3   : > { %v2650_v1 = vpop.f32.mrf.mxu1  ;;  %v1459_v14 = vadd.f32 %v2626_v61, %v1288_v8  ;;  %v3430_v33 = vld [vmem:[#allocation17_spill] sm:$0xff]  ;;  %v1627_v32 = vadd.f32 %v1608_v55, %v1456_v31 }
 0x1a4   : > { %v1440_v19 = vpop.f32.mrf.mxu0  ;;  %v1452_v15 = vadd.f32 %v1421_v30, %v1281_v9  ;;  %v1453_v26 = vadd.f32 %v1424_v34, %v1282_v13  ;;  %v1626_v38 = vadd.f32 %v3430_v33, %v1455_v12 }
 0x1a5   : > { %v1611_v22 = vpop.f32.mrf.mxu1  ;;  %v1457_v27 = vadd.f32 %v1440_v19, %v1286_v24  ;;  %v1630_v40 = vadd.f32 %v2650_v1, %v1459_v14  ;;  %v3431_v43 = vld [vmem:[#allocation18_spill] sm:$0xff] }
 0x1a6   : > { %v1623_v20 = vadd.f32 %v3429_v25, %v1452_v15  ;;  %v1624_v29 = vadd.f32 %v3431_v43, %v1453_v26 }
 0x1a7   : > { %v1628_v50 = vadd.f32 %v1611_v22, %v1457_v27 }
 0x1b6   : > { %v2669_v17 = vpop.f32.mrf.mxu0 }
 0x1b7   : > { %v2673_v16 = vpop.f32.mrf.mxu1  ;;  %v1796_v39 = vadd.f32 %v2669_v17, %v1625_v21 }
 0x1b8   : > { %v1763_v23 = vpop.f32.mrf.mxu0  ;;  %v1800_v41 = vadd.f32 %v2673_v16, %v1629_v18 }
 0x1b9   : > { %v1779_v30 = vpop.f32.mrf.mxu1  ;;  %v1794_v34 = vadd.f32 %v1763_v23, %v1623_v20  ;;  %v1811_v47 = vadd.f32 %v2307_v28, %v1796_v39 }
 0x1ba   : > { %v2670_v42 = vpop.f32.mrf.mxu0  ;;  %v1798_v54 = vadd.f32 %v1779_v30, %v1627_v32  ;;  %v1815_v52 = vadd.f32 %v2307_v28, %v1800_v41 }
 0x1bb   : > { %v1797_v44 = vadd.f32 %v2670_v42, %v1626_v38  ;;  %v2674_v46 = vpop.f32.mrf.mxu1  ;;  %v1809_v59 = vadd.f32 %v2307_v28, %v1794_v34 }
 0x1bc   : > { %v1801_v45 = vadd.f32 %v2674_v46, %v1630_v40  ;;  %v1766_v48 = vpop.f32.mrf.mxu0  ;;  %v1813_v49 = vadd.f32 %v2307_v28, %v1798_v54 }
 0x1bd   : > { %v1812_v51 = vadd.f32 %v2307_v28, %v1797_v44  ;;  %v1795_v35 = vadd.f32 %v1766_v48, %v1624_v29  ;;  %v1782_v58 = vpop.f32.mrf.mxu1 }
 0x1be   : > { %v1816_v56 = vadd.f32 %v2307_v28, %v1801_v45  ;;  %v1799_v55 = vadd.f32 %v1782_v58, %v1628_v50 }
 0x1bf   : > { %v2336_v3 = vpack.c.bf16 %v1812_v51, %v1811_v47  ;;  %v1810_v36 = vadd.f32 %v2307_v28, %v1795_v35 }
 0x1c0   : > { %v2346_v53 = vpack.c.bf16 %v1816_v56, %v1815_v52  ;;  %v1814_v60 = vadd.f32 %v2307_v28, %v1799_v55 }
 0x1c1   : > { %2348 = vst [vmem:[%s277_s9 + $0x8] sm:$0xff] %v2336_v3   ;;  %v2331_v63 = vpack.c.bf16 %v1810_v36, %v1809_v59 }
 0x1c2   : > { %2350 = vst [vmem:[%s277_s9 + $0x18] sm:$0xff] %v2346_v53   ;;  %v2341_v37 = vpack.c.bf16 %v1814_v60, %v1813_v49 }
 0x1c3   : > { %2332 = vst [vmem:[%s277_s9] sm:$0xff] %v2331_v63  }
 0x1c4   : > { %2349 = vst [vmem:[%s277_s9 + $0x10] sm:$0xff] %v2341_v37  }
 0x1c5   : > { %2979 = shalt.err (!%p2976_p0)
}
 0x1c6   : > { %s2980_s29 = scalar_lea.hbm %s3357_s25, 512  ;;  %s2984_s22 = scalar_lea.hbm %s3407_s3, 2048 }
 0x1c7   : > { %p2981_p1 = scmp.ne.s32.totalorder %s3357_s25, %s2980_s29  ;;  %p2985_p6 = scmp.lt.s32.totalorder %s3357_s25, %s3407_s3 }
 0x1c8   : > { %p2986_p7 = scmp.lt.s32.totalorder %s2984_s22, %s2980_s29 }
 0x1c9   : > { %p2982_p4 = pnand %p2981_p1, %p3133_p9 }
 0x1ca   : > { %p2987_p8 = por %p2986_p7, %p2985_p6 }
 0x1cb   : > { %p2983_p5 = pneg %p2982_p4 }
 0x1cd   : > { %p2988_p13 = pnand %p2987_p8, %p2983_p5 }
 0x1cf   : > { %2991 = shalt.err (!%p2988_p13)
}
 0x1d0   : > { %s3059_s4 = smov 64   ;;  %s3060_s7 = smov 256  }
 0x1d1   : > { %s3061_s18 = smov 4  }
 0x1d2   : > { %2702 = dma.vmem_to_hbm [thread:$0]  (%p3133_p9), %s3352_s6, 512, %s3357_s25, %s1858_s15, %s3059_s4, %s3060_s7, %s3061_s18  }
 0x1d3 PF: > { %p2719_p2 = scmp.ge.s32.totalorder %s3050_s17, 2  ;;  %s1888_s23 = sand.u32 1, %s3030_s12  }
 0x1d4   : > { %s1889_s9 = scalar_lea.sflag [#allocation4], %s1888_s23 }
 0x1d5   : > { %p2715_p3 = pnand %p2719_p2, %p3140_p11 }
 0x1d7   : > { %p2716_p10 = pneg %p2715_p3 }
 0x1d9   : > { %3025 = dma.done.wait (%p2716_p10), %s1889_s9, 512  }
 0x1da   : > { %3027 = vsyncadd (%p2716_p10), %s1889_s9, 4294966784  ;;  %s22_s17 = sadd.s32 1, %s3050_s17   ;;  %s3432_s5 = sld [smem:[#allocation12_spill]] }
 0x1db   : > { %p19_p12 = scmp.ge.s32.totalorder %s22_s17, 6   ;;  %s3433_s14 = sld [smem:[#allocation14_spill]] }
 0x1dc   : > { %s3434_s24 = sld [smem:[#allocation13_spill]]  ;;  %s3435_s12 = smov %s3034_s13 }
 0x1dd   : > { %s3437_s15 = smov %s3046_s16 }
 0x1de   :  { %21 = sbr.rel (!%p19_p12) target bundleno = 10 (0xa), region = 117 }
 0x1e0   : > { %s3436_s13 = smov %s3432_s5 }
 0x1e2   : > { %s3438_s16 = smov %s3434_s24 }
 0x1e3   :  { %1894 = vsyncpa [#allocation3], 1 }
 0x1e4   :  { %1896 = vsyncpa [#allocation3 + $0x1], 1 }
 0x1e5   :  { %1897 = vsyncpa [#allocation6], 1 }
 0x1e6   :  { %1899 = vsyncpa [#allocation6 + $0x1], 1 }
 0x1e7   :  { %1900 = vsyncpa [#allocation4], 1 }
 0x1e8   :  { %1902 = vsyncpa [#allocation4 + $0x1], 1 }

</bundles_post_ra>
